<compile_context>
chip_gen: v7x
topology: tpu7x:2x2x1
jax: 0.10.0
libtpu: 0.0.40
codegen_flags: <defaults>
</compile_context>

<pallas_src>
import functools

import jax
import jax.numpy as jnp
import numpy as np
from jax.experimental import pallas as pl
from jax.experimental.pallas import tpu as pltpu

N_EMBD = 30
NUM_HEADS = 6
HEAD_SIZE = N_EMBD // NUM_HEADS
EPS = 1e-5
NEG = -1e30     # finite mask bias (avoids 0*inf / 0/0 if mask semantics ever change)
LANES = 128


def _pack_params(params, B, T):
    """Pack all weights/biases + precomputed masks into one (rows, 128) f32 slab."""
    g1, be1, g2, be2, wk, wq, wv, wp, bp, w1, b1, w2, b2 = [
        np.asarray(p, np.float32) for p in params]
    C, H, hs = N_EMBD, NUM_HEADS, HEAD_SIZE
    BT, R = B * T, NUM_HEADS * B * T

    # QKV packed column-wise as [K | Q*scale | V]; attention scale folded into Q.
    wqkv = np.concatenate([wk, wq * C ** (-0.5), wv], axis=1)            # (C, 3C)
    vecs = np.concatenate([g1, be1, g2, be2, bp, b2], axis=0)            # (6, C)

    # Per-head channel masks for the replicated K^T / V operands.
    head_of_chan = np.arange(C) // hs                                    # (C,)
    head_of_col = np.arange(R) // BT                                     # (R,)
    head_maskT = (head_of_chan[:, None] == head_of_col[None, :]).astype(np.float32)  # (C, R)
    head_mask = np.ascontiguousarray(head_maskT.T)                       # (R, C)

    # Additive attention bias: 0 where same-batch & causal, -1e30 elsewhere.
    m = np.arange(BT)            # query row  = b'*T + t
    j = np.arange(R)             # key column = h*B*T + b*T + s
    same_batch = (m[:, None] // T) == ((j[None, :] // T) % B)
    causal = (m[:, None] % T) >= (j[None, :] % T)
    bias = np.where(same_batch & causal, 0.0, NEG).astype(np.float32)    # (BT, R)

    blocks = [("wqkv", wqkv), ("wp", wp), ("w1", w1), ("w2", w2),
              ("vecs", vecs), ("b1", b1), ("head_maskT", head_maskT),
              ("head_mask", head_mask), ("bias", bias)]
    offsets, cursor = {}, 0
    for name, arr in blocks:
        offsets[name] = (cursor, int(arr.shape[0]), int(arr.shape[1]))
        cursor += -(-arr.shape[0] // 8) * 8        # every block starts sublane-aligned
    slab = np.zeros((cursor, LANES), np.float32)
    for name, arr in blocks:
        r0, nr, nc = offsets[name]
        slab[r0:r0 + nr, :nc] = arr
    return slab, offsets


def _attn_ff_kernel(x_ref, slab_ref, o_ref, *, B, T, offsets):
    C, H = N_EMBD, NUM_HEADS
    BT, R = B * T, NUM_HEADS * B * T

    def ld(name):
        r0, nr, nc = offsets[name]
        return slab_ref[r0:r0 + nr, 0:nc]          # static slice of the param slab

    x = x_ref[...]                                  # (B, T, C)
    vecs = ld("vecs")                               # (6, C)
    g1, be1, g2, be2, bp, b2 = (vecs[i:i + 1] for i in range(6))

    def ln_seq(y, g, b):
        # mean / unbiased variance over the SEQUENCE axis (dim=1), as in the
        # reference Layer_norm (torch .mean(1) / .var(1)).
        mu = jnp.mean(y, axis=1, keepdims=True)
        var = jnp.sum((y - mu) ** 2, axis=1, keepdims=True) * (1.0 / (T - 1))
        return g * (y - mu) * jax.lax.rsqrt(var + EPS) + b

    # ---- LayerNorm 1 ----
    xn = ln_seq(x, g1, be1)                         # (B, T, C)
    xnf = xn.reshape(BT, C)

    # ---- packed QKV projection (scale already folded into the Q columns) ----
    qkv = jnp.dot(xnf, ld("wqkv"), preferred_element_type=jnp.float32)   # (BT, 3C)
    k = qkv[:, 0 * C:1 * C]
    q = qkv[:, 1 * C:2 * C]
    v = qkv[:, 2 * C:3 * C]

    # ---- all heads & batches at once ----
    # K is transposed once (small XLU op), replicated along lanes and masked
    # with the shipped per-head channel mask, so ONE native NN matmul produces
    # every per-head score block for every batch.
    k_repT = jnp.concatenate([k.T] * H, axis=1) * ld("head_maskT")       # (C, R)
    scores = jnp.dot(q, k_repT, preferred_element_type=jnp.float32)      # (BT, R)
    scores = scores + ld("bias")    # fused same-batch & causal mask (0 / -1e30)

    # softmax over the QUERY axis (== F.softmax(..., dim=1) on (B,T,T) scores)
    mx = jnp.max(scores, axis=0, keepdims=True)
    e = jnp.exp(scores - mx)
    s = jnp.sum(e, axis=0, keepdims=True)
    r = pl.reciprocal(s, approx=True)               # EUP vrcp
    r = r * (2.0 - s * r)                           # one Newton step -> f32 accuracy
    p = e * r

    # V replicated along rows & head-masked: P @ V_rep reassembles the
    # concatenated multi-head output in one matmul (heads own disjoint
    # channel groups; cross-batch probabilities are exactly zero).
    v_rep = jnp.concatenate([v] * H, axis=0) * ld("head_mask")           # (R, C)
    attn = jnp.dot(p, v_rep, preferred_element_type=jnp.float32)         # (BT, C)
    attn = jnp.dot(attn, ld("wp"), preferred_element_type=jnp.float32) + bp

    x2 = xn + attn.reshape(B, T, C)

    # ---- LayerNorm 2 + FeedForward + residual (single fused output store) ----
    x2n = ln_seq(x2, g2, be2)
    x2nf = x2n.reshape(BT, C)
    h1 = jnp.dot(x2nf, ld("w1"), preferred_element_type=jnp.float32) + ld("b1")
    h1 = jnp.maximum(h1, 0.0)
    ff = jnp.dot(h1, ld("w2"), preferred_element_type=jnp.float32) + b2
    o_ref[...] = x2n + ff.reshape(B, T, C)


def make_attn_ff_block(params, B, T):
    """Pack parameters ONCE at init; return a jitted forward(x) callable."""
    slab_np, offsets = _pack_params(params, B, T)
    slab = jnp.asarray(slab_np)
    kernel = functools.partial(_attn_ff_kernel, B=B, T=T, offsets=offsets)

    call = pl.pallas_call(
        kernel,
        out_shape=jax.ShapeDtypeStruct((B, T, N_EMBD), jnp.float32),
        grid_spec=pltpu.PrefetchScalarGridSpec(
            num_scalar_prefetch=0,
            grid=(1,),                              # whole problem in one grid step
            in_specs=[
                pl.BlockSpec((B, T, N_EMBD), lambda i: (0, 0, 0)),
                pl.BlockSpec(slab.shape, lambda i: (0, 0)),
            ],
            out_specs=pl.BlockSpec((B, T, N_EMBD), lambda i: (0, 0, 0)),
        ),
        compiler_params=pltpu.CompilerParams(
            dimension_semantics=("arbitrary",)),
    )

    @jax.jit
    def forward(x):
        return call(x, slab)

    return forward


def reference(x, params):
    # plain-JAX reference for validation, same (quirky-but-faithful) semantics
    g1, be1, g2, be2, wk, wq, wv, wp, bp, w1, b1, w2, b2 = params
    B, T, C = x.shape

    def ln(y, g, b):
        mu = y.mean(axis=1, keepdims=True)
        var = ((y - mu) ** 2).sum(axis=1, keepdims=True) / (T - 1)
        return g * (y - mu) / jnp.sqrt(var + EPS) + b

    xn = ln(x, g1, be1)
    Q, K, V = xn @ wq, xn @ wk, xn @ wv
    scale = C ** (-0.5)
    mask = jnp.tril(jnp.ones((T, T))) > 0
    outs = []
    for h in range(NUM_HEADS):
        sl = slice(h * HEAD_SIZE, (h + 1) * HEAD_SIZE)
        att = jnp.einsum('btd,bsd->bts', Q[..., sl], K[..., sl]) * scale
        att = jnp.where(mask, att, -jnp.inf)
        att = jax.nn.softmax(att, axis=1)
        outs.append(jnp.einsum('bts,bsd->btd', att, V[..., sl]))
    attn = jnp.concatenate(outs, -1) @ wp + bp
    x2 = xn + attn
    x2n = ln(x2, g2, be2)
    ff = jnp.maximum(x2n @ w1 + b1, 0.0) @ w2 + b2
    return x2n + ff


if __name__ == "__main__":
    key = jax.random.PRNGKey(0)
    ks = jax.random.split(key, 10)
    B, T = 2, 8
    s = 0.2

    x = jax.random.normal(ks[0], (B, T, N_EMBD), jnp.float32)

    # Layer_norm params (the reference uses plain ones/zeros tensors)
    g1 = jnp.ones((1, N_EMBD), jnp.float32)
    be1 = jnp.zeros((1, N_EMBD), jnp.float32)
    g2 = jnp.ones((1, N_EMBD), jnp.float32)
    be2 = jnp.zeros((1, N_EMBD), jnp.float32)
    # per-head key/query/value weights packed column-wise: [:, h*hs:(h+1)*hs]
    wk = jax.random.normal(ks[1], (N_EMBD, N_EMBD), jnp.float32) * s
    wq = jax.random.normal(ks[2], (N_EMBD, N_EMBD), jnp.float32) * s
    wv = jax.random.normal(ks[3], (N_EMBD, N_EMBD), jnp.float32) * s
    wp = jax.random.normal(ks[4], (N_EMBD, N_EMBD), jnp.float32) * s
    bp = jax.random.normal(ks[5], (1, N_EMBD), jnp.float32) * s
    # FeedForward: Linear(30 -> 120) -> ReLU -> Linear(120 -> 30)
    w1 = jax.random.normal(ks[6], (N_EMBD, 4 * N_EMBD), jnp.float32) * s
    b1 = jax.random.normal(ks[7], (1, 4 * N_EMBD), jnp.float32) * s
    w2 = jax.random.normal(ks[8], (4 * N_EMBD, N_EMBD), jnp.float32) * s
    b2 = jax.random.normal(ks[9], (1, N_EMBD), jnp.float32) * s

    params = [g1, be1, g2, be2, wk, wq, wv, wp, bp, w1, b1, w2, b2]

    forward = make_attn_ff_block(params, B, T)      # params packed once, at init
    out = forward(x)
    jax.block_until_ready(out)

    ref = reference(x, params)
    np.testing.assert_allclose(np.asarray(out), np.asarray(ref), rtol=1e-4, atol=1e-4)
    print("KERNEL_OK")
</pallas_src>

<mosaic_0001>
module attributes {stable_mosaic.version = 11 : i64} {
  func.func @_attn_ff_kernel(%arg0: i32, %arg1: memref<2x8x30xf32, #tpu.memory_space<vmem>>, %arg2: memref<376x128xf32, #tpu.memory_space<vmem>>, %arg3: memref<2x8x30xf32, #tpu.memory_space<vmem>>) attributes {dimension_semantics = [#tpu.dimension_semantics<arbitrary>], iteration_bounds = array<i64: 1>, scalar_prefetch = 0 : i64, scratch_operands = 0 : i64, tpu.core_type = #tpu.core_type<tc>, window_params = [{pipeline_mode = #tpu.pipeline_mode<synchronous>, transform_indices = @transform_0, window_bounds = array<i64: 2, 8, 30>}, {pipeline_mode = #tpu.pipeline_mode<synchronous>, transform_indices = @transform_1, window_bounds = array<i64: 376, 128>}, {pipeline_mode = #tpu.pipeline_mode<synchronous>, transform_indices = @transform_2, window_bounds = array<i64: 2, 8, 30>}]} {
    %c0 = arith.constant 0 : index
    %c0_0 = arith.constant 0 : index
    %c0_1 = arith.constant 0 : index
    %0 = vector.load %arg1[%c0, %c0_0, %c0_1] : memref<2x8x30xf32, #tpu.memory_space<vmem>>, vector<2x8x30xf32>
    %c216 = arith.constant 216 : index
    %c0_2 = arith.constant 0 : index
    %1 = vector.load %arg2[%c216, %c0_2] : memref<376x128xf32, #tpu.memory_space<vmem>>, vector<6x30xf32>
    %2 = vector.extract_strided_slice %1 {offsets = [0, 0], sizes = [1, 30], strides = [1, 1]} : vector<6x30xf32> to vector<1x30xf32>
    %3 = vector.extract_strided_slice %1 {offsets = [1, 0], sizes = [1, 30], strides = [1, 1]} : vector<6x30xf32> to vector<1x30xf32>
    %4 = vector.extract_strided_slice %1 {offsets = [2, 0], sizes = [1, 30], strides = [1, 1]} : vector<6x30xf32> to vector<1x30xf32>
    %5 = vector.extract_strided_slice %1 {offsets = [3, 0], sizes = [1, 30], strides = [1, 1]} : vector<6x30xf32> to vector<1x30xf32>
    %6 = vector.extract_strided_slice %1 {offsets = [4, 0], sizes = [1, 30], strides = [1, 1]} : vector<6x30xf32> to vector<1x30xf32>
    %7 = vector.extract_strided_slice %1 {offsets = [5, 0], sizes = [1, 30], strides = [1, 1]} : vector<6x30xf32> to vector<1x30xf32>
    %cst = arith.constant dense<0.000000e+00> : vector<2x30xf32>
    %8 = vector.multi_reduction <add>, %0, %cst [1] : vector<2x8x30xf32> to vector<2x30xf32>
    %9 = vector.shape_cast %8 : vector<2x30xf32> to vector<2x1x30xf32>
    %cst_3 = arith.constant 8.000000e+00 : f32
    %10 = vector.broadcast %cst_3 : f32 to vector<2x1x30xf32>
    %11 = arith.divf %9, %10 : vector<2x1x30xf32>
    %12 = vector.broadcast %11 : vector<2x1x30xf32> to vector<2x8x30xf32>
    %13 = arith.subf %0, %12 : vector<2x8x30xf32>
    %14 = arith.mulf %13, %13 : vector<2x8x30xf32>
    %cst_4 = arith.constant dense<0.000000e+00> : vector<2x30xf32>
    %15 = vector.multi_reduction <add>, %14, %cst_4 [1] : vector<2x8x30xf32> to vector<2x30xf32>
    %16 = vector.shape_cast %15 : vector<2x30xf32> to vector<2x1x30xf32>
    %cst_5 = arith.constant 0.142857149 : f32
    %17 = vector.broadcast %cst_5 : f32 to vector<2x1x30xf32>
    %18 = arith.mulf %16, %17 : vector<2x1x30xf32>
    %19 = vector.broadcast %11 : vector<2x1x30xf32> to vector<2x8x30xf32>
    %20 = arith.subf %0, %19 : vector<2x8x30xf32>
    %21 = vector.shape_cast %2 : vector<1x30xf32> to vector<1x1x30xf32>
    %22 = vector.broadcast %21 : vector<1x1x30xf32> to vector<2x8x30xf32>
    %23 = arith.mulf %22, %20 : vector<2x8x30xf32>
    %cst_6 = arith.constant 9.99999974E-6 : f32
    %24 = vector.broadcast %cst_6 : f32 to vector<2x1x30xf32>
    %25 = arith.addf %18, %24 : vector<2x1x30xf32>
    %26 = math.rsqrt %25 : vector<2x1x30xf32>
    %27 = vector.broadcast %26 : vector<2x1x30xf32> to vector<2x8x30xf32>
    %28 = arith.mulf %23, %27 : vector<2x8x30xf32>
    %29 = vector.shape_cast %3 : vector<1x30xf32> to vector<1x1x30xf32>
    %30 = vector.broadcast %29 : vector<1x1x30xf32> to vector<2x8x30xf32>
    %31 = arith.addf %28, %30 : vector<2x8x30xf32>
    %32 = vector.shape_cast %31 : vector<2x8x30xf32> to vector<16x30xf32>
    %c0_7 = arith.constant 0 : index
    %c0_8 = arith.constant 0 : index
    %33 = vector.load %arg2[%c0_7, %c0_8] : memref<376x128xf32, #tpu.memory_space<vmem>>, vector<30x90xf32>
    %cst_9 = arith.constant dense<0.000000e+00> : vector<16x90xf32>
    %34 = tpu.matmul %32, %33, %cst_9 {dimension_numbers = #tpu.dot_dimension_numbers<[1], [0], [0], [1], [0, 0, 1, 1], [], []>} : vector<16x30xf32>, vector<30x90xf32>, vector<16x90xf32> -> vector<16x90xf32>
    %35 = vector.extract_strided_slice %34 {offsets = [0, 0], sizes = [16, 30], strides = [1, 1]} : vector<16x90xf32> to vector<16x30xf32>
    %36 = vector.extract_strided_slice %34 {offsets = [0, 30], sizes = [16, 30], strides = [1, 1]} : vector<16x90xf32> to vector<16x30xf32>
    %37 = vector.extract_strided_slice %34 {offsets = [0, 60], sizes = [16, 30], strides = [1, 1]} : vector<16x90xf32> to vector<16x30xf32>
    %38 = tpu.transpose %35, [1, 0] : vector<16x30xf32> -> vector<30x16xf32>
    %39 = tpu.concatenate %38, %38, %38, %38, %38, %38 in 1 : vector<30x16xf32>, vector<30x16xf32>, vector<30x16xf32>, vector<30x16xf32>, vector<30x16xf32>, vector<30x16xf32> -> vector<30x96xf32>
    %c232 = arith.constant 232 : index
    %c0_10 = arith.constant 0 : index
    %40 = vector.load %arg2[%c232, %c0_10] : memref<376x128xf32, #tpu.memory_space<vmem>>, vector<30x96xf32>
    %41 = arith.mulf %39, %40 : vector<30x96xf32>
    %cst_11 = arith.constant dense<0.000000e+00> : vector<16x96xf32>
    %42 = tpu.matmul %36, %41, %cst_11 {dimension_numbers = #tpu.dot_dimension_numbers<[1], [0], [0], [1], [0, 0, 1, 1], [], []>} : vector<16x30xf32>, vector<30x96xf32>, vector<16x96xf32> -> vector<16x96xf32>
    %c360 = arith.constant 360 : index
    %c0_12 = arith.constant 0 : index
    %43 = vector.load %arg2[%c360, %c0_12] : memref<376x128xf32, #tpu.memory_space<vmem>>, vector<16x96xf32>
    %44 = arith.addf %42, %43 : vector<16x96xf32>
    %cst_13 = arith.constant dense<0xFF800000> : vector<96xf32>
    %45 = vector.multi_reduction <maximumf>, %44, %cst_13 [0] : vector<16x96xf32> to vector<96xf32>
    %46 = vector.shape_cast %45 : vector<96xf32> to vector<1x96xf32>
    %47 = vector.broadcast %46 : vector<1x96xf32> to vector<16x96xf32>
    %48 = arith.subf %44, %47 : vector<16x96xf32>
    %49 = math.exp %48 : vector<16x96xf32>
    %cst_14 = arith.constant dense<0.000000e+00> : vector<96xf32>
    %50 = vector.multi_reduction <add>, %49, %cst_14 [0] : vector<16x96xf32> to vector<96xf32>
    %51 = vector.shape_cast %50 : vector<96xf32> to vector<1x96xf32>
    %52 = tpu.reciprocal %51 {approx = true} : vector<1x96xf32> -> vector<1x96xf32>
    %53 = arith.mulf %51, %52 : vector<1x96xf32>
    %cst_15 = arith.constant 2.000000e+00 : f32
    %54 = vector.broadcast %cst_15 : f32 to vector<1x96xf32>
    %55 = arith.subf %54, %53 : vector<1x96xf32>
    %56 = arith.mulf %52, %55 : vector<1x96xf32>
    %57 = vector.broadcast %56 : vector<1x96xf32> to vector<16x96xf32>
    %58 = arith.mulf %49, %57 : vector<16x96xf32>
    %59 = tpu.concatenate %37, %37, %37, %37, %37, %37 in 0 : vector<16x30xf32>, vector<16x30xf32>, vector<16x30xf32>, vector<16x30xf32>, vector<16x30xf32>, vector<16x30xf32> -> vector<96x30xf32>
    %c264 = arith.constant 264 : index
    %c0_16 = arith.constant 0 : index
    %60 = vector.load %arg2[%c264, %c0_16] : memref<376x128xf32, #tpu.memory_space<vmem>>, vector<96x30xf32>
    %61 = arith.mulf %59, %60 : vector<96x30xf32>
    %cst_17 = arith.constant dense<0.000000e+00> : vector<16x30xf32>
    %62 = tpu.matmul %58, %61, %cst_17 {dimension_numbers = #tpu.dot_dimension_numbers<[1], [0], [0], [1], [0, 0, 1, 1], [], []>} : vector<16x96xf32>, vector<96x30xf32>, vector<16x30xf32> -> vector<16x30xf32>
    %c32 = arith.constant 32 : index
    %c0_18 = arith.constant 0 : index
    %63 = vector.load %arg2[%c32, %c0_18] : memref<376x128xf32, #tpu.memory_space<vmem>>, vector<30x30xf32>
    %cst_19 = arith.constant dense<0.000000e+00> : vector<16x30xf32>
    %64 = tpu.matmul %62, %63, %cst_19 {dimension_numbers = #tpu.dot_dimension_numbers<[1], [0], [0], [1], [0, 0, 1, 1], [], []>} : vector<16x30xf32>, vector<30x30xf32>, vector<16x30xf32> -> vector<16x30xf32>
    %65 = vector.broadcast %6 : vector<1x30xf32> to vector<16x30xf32>
    %66 = arith.addf %64, %65 : vector<16x30xf32>
    %67 = vector.shape_cast %66 : vector<16x30xf32> to vector<2x8x30xf32>
    %68 = arith.addf %31, %67 : vector<2x8x30xf32>
    %cst_20 = arith.constant dense<0.000000e+00> : vector<2x30xf32>
    %69 = vector.multi_reduction <add>, %68, %cst_20 [1] : vector<2x8x30xf32> to vector<2x30xf32>
    %70 = vector.shape_cast %69 : vector<2x30xf32> to vector<2x1x30xf32>
    %cst_21 = arith.constant 8.000000e+00 : f32
    %71 = vector.broadcast %cst_21 : f32 to vector<2x1x30xf32>
    %72 = arith.divf %70, %71 : vector<2x1x30xf32>
    %73 = vector.broadcast %72 : vector<2x1x30xf32> to vector<2x8x30xf32>
    %74 = arith.subf %68, %73 : vector<2x8x30xf32>
    %75 = arith.mulf %74, %74 : vector<2x8x30xf32>
    %cst_22 = arith.constant dense<0.000000e+00> : vector<2x30xf32>
    %76 = vector.multi_reduction <add>, %75, %cst_22 [1] : vector<2x8x30xf32> to vector<2x30xf32>
    %77 = vector.shape_cast %76 : vector<2x30xf32> to vector<2x1x30xf32>
    %cst_23 = arith.constant 0.142857149 : f32
    %78 = vector.broadcast %cst_23 : f32 to vector<2x1x30xf32>
    %79 = arith.mulf %77, %78 : vector<2x1x30xf32>
    %80 = vector.broadcast %72 : vector<2x1x30xf32> to vector<2x8x30xf32>
    %81 = arith.subf %68, %80 : vector<2x8x30xf32>
    %82 = vector.shape_cast %4 : vector<1x30xf32> to vector<1x1x30xf32>
    %83 = vector.broadcast %82 : vector<1x1x30xf32> to vector<2x8x30xf32>
    %84 = arith.mulf %83, %81 : vector<2x8x30xf32>
    %cst_24 = arith.constant 9.99999974E-6 : f32
    %85 = vector.broadcast %cst_24 : f32 to vector<2x1x30xf32>
    %86 = arith.addf %79, %85 : vector<2x1x30xf32>
    %87 = math.rsqrt %86 : vector<2x1x30xf32>
    %88 = vector.broadcast %87 : vector<2x1x30xf32> to vector<2x8x30xf32>
    %89 = arith.mulf %84, %88 : vector<2x8x30xf32>
    %90 = vector.shape_cast %5 : vector<1x30xf32> to vector<1x1x30xf32>
    %91 = vector.broadcast %90 : vector<1x1x30xf32> to vector<2x8x30xf32>
    %92 = arith.addf %89, %91 : vector<2x8x30xf32>
    %93 = vector.shape_cast %92 : vector<2x8x30xf32> to vector<16x30xf32>
    %c64 = arith.constant 64 : index
    %c0_25 = arith.constant 0 : index
    %94 = vector.load %arg2[%c64, %c0_25] : memref<376x128xf32, #tpu.memory_space<vmem>>, vector<30x120xf32>
    %cst_26 = arith.constant dense<0.000000e+00> : vector<16x120xf32>
    %95 = tpu.matmul %93, %94, %cst_26 {dimension_numbers = #tpu.dot_dimension_numbers<[1], [0], [0], [1], [0, 0, 1, 1], [], []>} : vector<16x30xf32>, vector<30x120xf32>, vector<16x120xf32> -> vector<16x120xf32>
    %c224 = arith.constant 224 : index
    %c0_27 = arith.constant 0 : index
    %96 = vector.load %arg2[%c224, %c0_27] : memref<376x128xf32, #tpu.memory_space<vmem>>, vector<1x120xf32>
    %97 = vector.broadcast %96 : vector<1x120xf32> to vector<16x120xf32>
    %98 = arith.addf %95, %97 : vector<16x120xf32>
    %cst_28 = arith.constant 0.000000e+00 : f32
    %99 = vector.broadcast %cst_28 : f32 to vector<16x120xf32>
    %100 = arith.maximumf %98, %99 : vector<16x120xf32>
    %c96 = arith.constant 96 : index
    %c0_29 = arith.constant 0 : index
    %101 = vector.load %arg2[%c96, %c0_29] : memref<376x128xf32, #tpu.memory_space<vmem>>, vector<120x30xf32>
    %cst_30 = arith.constant dense<0.000000e+00> : vector<16x30xf32>
    %102 = tpu.matmul %100, %101, %cst_30 {dimension_numbers = #tpu.dot_dimension_numbers<[1], [0], [0], [1], [0, 0, 1, 1], [], []>} : vector<16x120xf32>, vector<120x30xf32>, vector<16x30xf32> -> vector<16x30xf32>
    %103 = vector.broadcast %7 : vector<1x30xf32> to vector<16x30xf32>
    %104 = arith.addf %102, %103 : vector<16x30xf32>
    %105 = vector.shape_cast %104 : vector<16x30xf32> to vector<2x8x30xf32>
    %106 = arith.addf %92, %105 : vector<2x8x30xf32>
    %c0_31 = arith.constant 0 : index
    %c0_32 = arith.constant 0 : index
    %c0_33 = arith.constant 0 : index
    %107 = vector.load %arg3[%c0_31, %c0_32, %c0_33] : memref<2x8x30xf32, #tpu.memory_space<vmem>>, vector<2x8x30xf32>
    tpu.vector_store %arg3[%c0_31, %c0_32, %c0_33], %106 {strides = array<i32>} : memref<2x8x30xf32, #tpu.memory_space<vmem>>, vector<2x8x30xf32>,
    return
  }
  func.func @transform_0(%arg0: i32) -> (i32, i32, i32) {
    %c0_i32 = arith.constant 0 : i32
    %c0_i32_0 = arith.constant 0 : i32
    %c0_i32_1 = arith.constant 0 : i32
    %c0_i32_2 = arith.constant 0 : i32
    return %c0_i32, %c0_i32_0, %c0_i32_1 : i32, i32, i32
  }
  func.func @transform_1(%arg0: i32) -> (i32, i32) {
    %c0_i32 = arith.constant 0 : i32
    %c0_i32_0 = arith.constant 0 : i32
    %c0_i32_1 = arith.constant 0 : i32
    return %c0_i32, %c0_i32_0 : i32, i32
  }
  func.func @transform_2(%arg0: i32) -> (i32, i32, i32) {
    %c0_i32 = arith.constant 0 : i32
    %c0_i32_0 = arith.constant 0 : i32
    %c0_i32_1 = arith.constant 0 : i32
    %c0_i32_2 = arith.constant 0 : i32
    return %c0_i32, %c0_i32_0, %c0_i32_1 : i32, i32, i32
  }
}

</mosaic_0001>

<bundles_post_ra>
// kernel: forward.1
= control target key start
LH: loop header
LB: loop body
LE: loop exit
PB: predicated region body
PF: predicated region fallthrough
CT: control target
= control target key end

     0   :  { %7 = vsyncpa [#allocation3], 0  ;;  %s1654_s0 = inlined_call_operand.hbm [shape: f32[2,8,30], index: 0, kind: input, shape index: {}]   ;;  %s1655_s1 = inlined_call_operand.hbm [shape: f32[376,128], index: 1, kind: input, shape index: {}]   ;;  %s1656_s2 = inlined_call_operand.hbm [shape: f32[2,8,30], index: 2, kind: output, shape index: {}]  }
   0x1   :  { %8 = vsyncpa [#allocation6], 0 }
   0x2   :  { %9 = vsyncpa [#allocation4], 0  ;;  %s1404_s9 = smov [#allocation2]   ;;  %s1332_s13 = scalar_lea.hbm %s1654_s0, 256 }
   0x3   :  { %s15_s10 = sshll.u32 %s1404_s9, 4  ;;  %p1333_p0 = scmp.ne.s32.totalorder %s1654_s0, %s1332_s13  ;;  %s16_s10 = int_to_ptr.vmem [resolvable:$true] %s15_s10 }
   0x4   :  { %p1336_p1 = scmp.lt.u32.totalorder %s1332_s13, %s1654_s0 }
   0x6   :  { %p1338_p2 = pnand %p1336_p1, %p1333_p0 }
   0x8   :  { %1341 = shalt.err (!%p1338_p2)
}
   0x9   :  { %s1342_s18 = scalar_lea.vmem %s16_s10, 256  ;;  %p1347_p4 = scmp.lt.s32.totalorder %s16_s10, %s16_s10 }
   0xa   :  { %p1343_p3 = scmp.ne.s32.totalorder %s16_s10, %s1342_s18  ;;  %p1348_p5 = scmp.lt.s32.totalorder %s1342_s18, %s1342_s18 }
   0xc   :  { %p1349_p6 = por %p1348_p5, %p1347_p4 }
   0xe   :  { %p1350_p7 = pnand %p1349_p6, %p1343_p3 }
  0x10   :  { %1353 = shalt.err (!%p1350_p7)
}
  0x11   :  { %s1405_s19 = smov 128   ;;  %s1406_s20 = smov 8  }
  0x12   :  { %21 = dma.hbm_to_vmem [thread:$0]  %s1654_s0, 256, %s16_s10, [#allocation3], %s1405_s19, %s1405_s19, %s1406_s20  }
  0x13   :  { %s1407_s23 = smov [#allocation5]   ;;  %s1354_s27 = scalar_lea.hbm %s1655_s1, 6016 }
  0x14   :  { %s27_s24 = sshll.u32 %s1407_s23, 4  ;;  %p1355_p8 = scmp.ne.s32.totalorder %s1655_s1, %s1354_s27  ;;  %s28_s24 = int_to_ptr.vmem [resolvable:$true] %s27_s24 }
  0x15   :  { %p1358_p9 = scmp.lt.u32.totalorder %s1354_s27, %s1655_s1 }
  0x17   :  { %p1360_p10 = pnand %p1358_p9, %p1355_p8 }
  0x19   :  { %1363 = shalt.err (!%p1360_p10)
}
  0x1a   :  { %s1364_s4 = scalar_lea.vmem %s28_s24, 6016  ;;  %p1369_p12 = scmp.lt.s32.totalorder %s28_s24, %s28_s24 }
  0x1b   :  { %p1365_p11 = scmp.ne.s32.totalorder %s28_s24, %s1364_s4  ;;  %p1370_p13 = scmp.lt.s32.totalorder %s1364_s4, %s1364_s4 }
  0x1d   :  { %p1371_p0 = por %p1370_p13, %p1369_p12 }
  0x1f   :  { %p1372_p1 = pnand %p1371_p0, %p1365_p11 }
  0x21   :  { %1375 = shalt.err (!%p1372_p1)
}
  0x22   :  { %33 = dma.hbm_to_vmem [thread:$0]  %s1655_s1, 6016, %s28_s24, [#allocation6], %s1405_s19, %s1405_s19, %s1406_s20  }
  0x23   :  { %1398 = dma.done.wait [#allocation3], 256  }
  0x24   :  { %1399 = vsyncadd [#allocation3], 4294967040 }
  0x25   :  { %1400 = dma.done.wait [#allocation6], 6016  }
  0x26   :  { %1401 = vsyncadd [#allocation6], 4294961280  ;;  %vm109_vm0 = vcmask 1045504   ;;  %vm43_vm1 = vcmask 244736   ;;  %v99_v0 = vld [vmem:[#allocation5] sm:$0xff]  ;;  %v100_v1 = vld [vmem:[#allocation5 + $0x8] sm:$0xff]  ;;  %v81_v39 = vlaneseq }
  0x27   :  { %v101_v2 = vld [vmem:[#allocation5 + $0x10] sm:$0xff]  ;;  %v1181_v3 = vpack.c.bf16 %v100_v1, %v99_v0  ;;  %v102_v4 = vld [vmem:[#allocation5 + $0x18] sm:$0x3f]  ;;  %vm1408_vm2 = vmmov 1   ;;  %s1409_s1 = smov 32   ;;  %s1410_s6 = smov 16  }
  0x28   :  { %v40_v5 = vld [vmem:[#allocation2] sm:$0xff]  ;;  %v41_v6 = vld [vmem:[#allocation2 + $0x8] sm:$0xff]  ;;  %v1185_v7 = vpack.c.bf16 %v102_v4, %v101_v2  ;;  %vm1463_vm3 = vmpackc.low %vm109_vm0, %vm1408_vm2  ;;  %v1475_v44 = vshrl.u32 %v81_v39, 7  ;;  %s1411_s7 = smov 48   ;;  %s1412_s8 = smov 64   ;;  %vm284_vm4 = vcmask 130048  }
  0x29   :  { %v44_v9 = vsel %vm43_vm1, %v40_v5, 0.0  ;;  %v51_v10 = vsel %vm43_vm1, %v41_v6, 0.0  ;;  %1182 = vmatprep.subr.bf16.mxu0 %v1181_v3  ;;  %v1478_v50 = vld [vmem:[#allocation5 + $0xd8] sm:$0x3f]  ;;  %s1413_s9 = smov 80   ;;  %s1414_s10 = smov 98  }
  0x2a   :  { %v45_v11 = vrot.slane %v44_v9, 4  ;;  %v52_v12 = vrot.slane %v51_v10, 4  ;;  %1184 = vmatpush3.bf16.msra.mxu0 %v1181_v3  ;;  %v83_v49 = vsub.s32 0, %v1475_v44  ;;  %v95_v52 = vsub.s32 1, %v1475_v44  ;;  %v438_v3 = vld [vmem:[#allocation5 + $0x108] sm:$0xff]  ;;  %s1415_s11 = smov 60  }
  0x2b   :  { %1187 = vmatprep.subr.msk.bf16.mxu0 %vm1463_vm3, %v1185_v7  ;;  %v440_v4 = vld [vmem:[#allocation5 + $0x118] sm:$0xff]  ;;  %vm289_vm5 = vcmask 261120   ;;  %vm294_vm6 = vcmask 392192   ;;  %vm299_vm7 = vcmask 523264   ;;  %vm304_vm8 = vcmask 654336   ;;  %s1416_s12 = smov 68  }
  0x2c   :  { %v46_v13 = vadd.f32 %v45_v11, %v44_v9  ;;  %v53_v14 = vadd.f32 %v52_v12, %v51_v10  ;;  %v84_v51 = vrot.slane %v1478_v50, %v83_v49  ;;  %v96_v55 = vrot.slane %v1478_v50, %v95_v52  ;;  %v448_v9 = vld [vmem:[#allocation5 + $0x158] sm:$0xff]  ;;  %v439_v11 = vld [vmem:[#allocation5 + $0x110] sm:$0xff]  ;;  %v441_v12 = vld [vmem:[#allocation5 + $0x120] sm:$0xff]  ;;  %s1417_s13 = smov [#allocation7]  }
  0x2d   :  { %vm407_vm9 = vcmask 785408   ;;  %vm901_vm10 = vcmask 982016   ;;  %s992_s14 = sshll.u32 %s1417_s13, 4  ;;  %s993_s14 = int_to_ptr.vmem [resolvable:$true] %s992_s14 }
  0x2e   :  { %v47_v15 = vrot.slane %v46_v13, 2  ;;  %v54_v16 = vrot.slane %v53_v14, 2  ;;  %1190 = vmatpush3.bf16.msk.msra.mxu0 %vm1463_vm3, %v1185_v7  ;;  %v446_v7 = vld [vmem:[#allocation5 + $0x148] sm:$0xff]  ;;  %s1376_s15 = scalar_lea.vmem %s993_s14, 256  ;;  %p1381_p3 = scmp.lt.s32.totalorder %s993_s14, %s993_s14 }
  0x2f   :  { %p1377_p2 = scmp.ne.s32.totalorder %s993_s14, %s1376_s15  ;;  %p1382_p4 = scmp.lt.s32.totalorder %s1376_s15, %s1376_s15 }
  0x30   :  { %v48_v17 = vadd.f32 %v47_v15, %v46_v13  ;;  %v55_v18 = vadd.f32 %v54_v16, %v53_v14  ;;  %v443_v13 = vld [vmem:[#allocation5 + $0x130] sm:$0xff]  ;;  %v445_v14 = vld [vmem:[#allocation5 + $0x140] sm:$0xff] }
  0x31   :  { %v447_v15 = vld [vmem:[#allocation5 + $0x150] sm:$0xff]  ;;  %v449_v16 = vld [vmem:[#allocation5 + $0x160] sm:$0xff]  ;;  %p1383_p5 = por %p1382_p4, %p1381_p3 }
  0x32   :  { %v49_v19 = vrot.slane %v48_v17, 1  ;;  %v56_v20 = vrot.slane %v55_v18, 1 }
  0x33   :  { %p1384_p6 = pnand %p1383_p5, %p1377_p2 }
  0x34   :  { %v50_v21 = vadd.f32 %v49_v19, %v48_v17  ;;  %v57_v22 = vadd.f32 %v56_v20, %v55_v18 }
  0x36   :  { %v59_v23 = vmul.f32 0.125, %v50_v21  ;;  %v60_v24 = vmul.f32 0.125, %v57_v22 }
  0x38   :  { %v61_v25 = vsub.f32 %v40_v5, %v59_v23  ;;  %v62_v26 = vsub.f32 %v41_v6, %v60_v24  ;;  %v442_v5 = vld [vmem:[#allocation5 + $0x128] sm:$0xff]  ;;  %v444_v6 = vld [vmem:[#allocation5 + $0x138] sm:$0xff] }
  0x3a   :  { %v63_v27 = vmul.f32 %v61_v25, %v61_v25  ;;  %v64_v28 = vmul.f32 %v62_v26, %v62_v26  ;;  %v85_v53 = vmul.f32 %v84_v51, %v61_v25  ;;  %v86_v54 = vmul.f32 %v84_v51, %v62_v26 }
  0x3c   :  { %v65_v29 = vsel %vm43_vm1, %v63_v27, 0.0  ;;  %v72_v30 = vsel %vm43_vm1, %v64_v28, 0.0 }
  0x3d   :  { %v66_v31 = vrot.slane %v65_v29, 4  ;;  %v73_v32 = vrot.slane %v72_v30, 4 }
  0x3f   :  { %v67_v33 = vadd.f32 %v66_v31, %v65_v29  ;;  %v74_v34 = vadd.f32 %v73_v32, %v72_v30 }
  0x41   :  { %v68_v35 = vrot.slane %v67_v33, 2  ;;  %v75_v36 = vrot.slane %v74_v34, 2 }
  0x43   :  { %v69_v37 = vadd.f32 %v68_v35, %v67_v33  ;;  %v76_v38 = vadd.f32 %v75_v36, %v74_v34  ;;  %v309_v35 = vld [vmem:[#allocation5 + $0xe8] sm:$0xff] }
  0x45   :  { %v70_v40 = vrot.slane %v69_v37, 1  ;;  %v77_v41 = vrot.slane %v76_v38, 1 }
  0x47   :  { %v71_v42 = vadd.f32 %v70_v40, %v69_v37  ;;  %v78_v43 = vadd.f32 %v77_v41, %v76_v38  ;;  %v310_v38 = vld [vmem:[#allocation5 + $0xf0] sm:$0xff] }
  0x49   :  { %v79_v45 = vmul.f32 0.14285715, %v71_v42  ;;  %v80_v46 = vmul.f32 0.14285715, %v78_v43 }
  0x4b   :  { %v87_v47 = vadd.f32 1e-05, %v79_v45  ;;  %v88_v48 = vadd.f32 1e-05, %v80_v46 }
  0x4d   :  { %1318 = vrsqrt.f32 %v87_v47 }
  0x4e   :  { %1320 = vrsqrt.f32 %v88_v48 }
  0x57   :  { %v1319_v56 = vpop.eup %1318 }
  0x58   :  { %v1321_v57 = vpop.eup %1320  ;;  %v91_v58 = vmul.f32 %v1319_v56, %v85_v53 }
  0x59   :  { %v92_v59 = vmul.f32 %v1321_v57, %v86_v54 }
  0x5a   :  { %v1483_v60 = vadd.f32 %v96_v55, %v91_v58 }
  0x5b   :  { %v1485_v61 = vadd.f32 %v96_v55, %v92_v59 }
  0x5c   :  { %1085 = vmatprep.mubr.msk.f32.mxu0 %vm43_vm1, %v1483_v60 }
  0x5d   :  { %1086 = vmatmul.mubr.msk.f32.vlgmr.msra.gmra.mrb[0].mxu0 %vm43_vm1, %v1485_v61 }
 0x130   :  { %v1491_v62 = vpop.f32.mrb[0].mxu0 }
 0x131   :  { %v1493_v63 = vpop.f32.mrb[1].mxu0 }
 0x132   :  { %188 = vxpose.xlu0.b32.start [1/2] (short) (narrow) %v1493_v63, 32 }
 0x136   :  { %189 = vxpose.xlu0.b32.end [2/2] (short) (narrow) %v1491_v62, 32 }
 0x1b2   :  { %v1497_v0 = vpop.trf.xlu0 }
 0x1b3   :  { %236 = vrot.lane.b32.xlu0 %v1497_v0, %s1409_s1  ;;  %224 = vrot.lane.b32.xlu1 %v1497_v0, %s1410_s6 }
 0x1b6   :  { %v1503_v1 = vpop.trf.xlu0 }
 0x1b7   :  { %248 = vrot.lane.b32.xlu1 %v1497_v0, %s1411_s7 }
 0x1ba   :  { %v1507_v2 = vpop.trf.xlu0 }
 0x1bb   :  { %260 = vrot.lane.b32.xlu1 %v1497_v0, %s1412_s8  ;;  %264 = vrot.lane.b32.xlu0 %v1507_v2, %s1412_s8 }
 0x1be   :  { %v1540_v10 = vpop.trf.xlu0 }
 0x1bf   :  { %272 = vrot.lane.b32.xlu1 %v1497_v0, %s1413_s9  ;;  %276 = vrot.lane.b32.xlu0 %v1507_v2, %s1413_s9 }
 0x1c3   :  { %226 = vrot.lane.b32.xlu1 %v1503_v1, %s1410_s6  ;;  %321 = vrot.lane.b32.xlu0 %v1493_v63, %s1414_s10 }
 0x1c7   :  { %238 = vrot.lane.b32.xlu1 %v1503_v1, %s1409_s1  ;;  %462 = vrot.lane.b32.xlu0 %v438_v3, %s1415_s11 }
 0x1cb   :  { %250 = vrot.lane.b32.xlu1 %v1503_v1, %s1411_s7  ;;  %466 = vrot.lane.b32.xlu0 %v440_v4, %s1415_s11  ;;  %v311_v4 = vld [vmem:[#allocation5 + $0xf8] sm:$0xff] }
 0x1cf   :  { %262 = vrot.lane.b32.xlu1 %v1503_v1, %s1412_s8  ;;  %470 = vrot.lane.b32.xlu0 %v442_v5, %s1415_s11 }
 0x1d3   :  { %274 = vrot.lane.b32.xlu1 %v1503_v1, %s1413_s9  ;;  %474 = vrot.lane.b32.xlu0 %v444_v6, %s1415_s11 }
 0x1d7   :  { %478 = vrot.lane.b32.xlu0 %v446_v7, %s1415_s11  ;;  %228 = vrot.lane.b32.xlu1 %v1507_v2, %s1410_s6 }
 0x1db   :  { %482 = vrot.lane.b32.xlu0 %v448_v9, %s1415_s11  ;;  %240 = vrot.lane.b32.xlu1 %v1507_v2, %s1409_s1 }
 0x1df   :  { %252 = vrot.lane.b32.xlu1 %v1507_v2, %s1411_s7 }
 0x1e3   :  { %230 = vrot.lane.b32.xlu1 %v1540_v10, %s1410_s6 }
 0x1e7   :  { %242 = vrot.lane.b32.xlu1 %v1540_v10, %s1409_s1 }
 0x1eb   :  { %254 = vrot.lane.b32.xlu1 %v1540_v10, %s1411_s7 }
 0x1ef   :  { %266 = vrot.lane.b32.xlu1 %v1540_v10, %s1412_s8 }
 0x1f3   :  { %278 = vrot.lane.b32.xlu1 %v1540_v10, %s1413_s9 }
 0x1f7   :  { %323 = vrot.lane.b32.xlu1 %v1491_v62, %s1414_s10 }
 0x1fb   :  { %464 = vrot.lane.b32.xlu1 %v439_v11, %s1415_s11 }
 0x1ff   :  { %468 = vrot.lane.b32.xlu1 %v441_v12, %s1415_s11 }
 0x203   :  { %472 = vrot.lane.b32.xlu1 %v443_v13, %s1415_s11 }
 0x207   :  { %476 = vrot.lane.b32.xlu1 %v445_v14, %s1415_s11 }
 0x20b   :  { %480 = vrot.lane.b32.xlu1 %v447_v15, %s1415_s11 }
 0x20f   :  { %484 = vrot.lane.b32.xlu1 %v449_v16, %s1415_s11 }
 0x225   :  { %v225_v17 = vpop.permute.xlu1 %224  ;;  %v237_v18 = vpop.permute.xlu0 %236 }
 0x226   :  { %v285_v28 = vsel %vm284_vm4, %v1497_v0, %v225_v17 }
 0x227   :  { %v290_v29 = vsel %vm289_vm5, %v285_v28, %v237_v18 }
 0x229   :  { %v249_v19 = vpop.permute.xlu1 %248 }
 0x22a   :  { %v295_v31 = vsel %vm294_vm6, %v290_v29, %v249_v19 }
 0x22d   :  { %v261_v20 = vpop.permute.xlu1 %260  ;;  %v265_v21 = vpop.permute.xlu0 %264 }
 0x22e   :  { %v300_v33 = vsel %vm299_vm7, %v295_v31, %v261_v20 }
 0x231   :  { %v273_v22 = vpop.permute.xlu1 %272  ;;  %v277_v23 = vpop.permute.xlu0 %276 }
 0x232   :  { %v305_v36 = vsel %vm304_vm8, %v300_v33, %v273_v22 }
 0x233   :  { %v313_v42 = vmul.f32 %v309_v35, %v305_v36 }
 0x235   :  { %v227_v24 = vpop.permute.xlu1 %226  ;;  %v322_v25 = vpop.permute.xlu0 %321 }
 0x236   :  { %1096 = vmatprep.mubr.msk.f32.mxu0 %vm43_vm1, %v322_v25  ;;  %v286_v32 = vsel %vm284_vm4, %v1503_v1, %v227_v24 }
 0x239   :  { %v239_v26 = vpop.permute.xlu1 %238  ;;  %v463_v56 = vpop.permute.xlu0 %462 }
 0x23a   :  { %v291_v34 = vsel %vm289_vm5, %v286_v32, %v239_v26  ;;  %v498_v16 = vmul.f32 %v463_v56, %v1493_v63 }
 0x23d   :  { %v251_v27 = vpop.permute.xlu1 %250  ;;  %v467_v9 = vpop.permute.xlu0 %466 }
 0x23e   :  { %v296_v37 = vsel %vm294_vm6, %v291_v34, %v251_v27  ;;  %v500_v20 = vmul.f32 %v467_v9, %v1493_v63  ;;  %v641_v9 = vld [vmem:[#allocation5 + $0x30] sm:$0xff] }
 0x241   :  { %v263_v30 = vpop.permute.xlu1 %262 }
 0x242   :  { %v301_v39 = vsel %vm299_vm7, %v296_v37, %v263_v30 }
 0x245   :  { %v275_v40 = vpop.permute.xlu1 %274 }
 0x246   :  { %v306_v41 = vsel %vm304_vm8, %v301_v39, %v275_v40 }
 0x247   :  { %v314_v43 = vmul.f32 %v310_v38, %v306_v41 }
 0x249   :  { %v229_v45 = vpop.permute.xlu1 %228  ;;  %v1191_v46 = vpack.c.bf16 %v314_v43, %v313_v42 }
 0x24a   :  { %v287_v52 = vsel %vm284_vm4, %v1507_v2, %v229_v45  ;;  %v312_v2 = vld [vmem:[#allocation5 + $0x100] sm:$0x3f] }
 0x24b   :  { %1192 = vmatprep.subr.bf16.mxu0 %v1191_v46 }
 0x24c   :  { %1194 = vmatpush3.bf16.msra.mxu0 %v1191_v46 }
 0x24d   :  { %v241_v47 = vpop.permute.xlu1 %240 }
 0x24e   :  { %v292_v53 = vsel %vm289_vm5, %v287_v52, %v241_v47 }
 0x251   :  { %v253_v48 = vpop.permute.xlu1 %252 }
 0x252   :  { %v297_v55 = vsel %vm294_vm6, %v292_v53, %v253_v48 }
 0x253   :  { %v302_v57 = vsel %vm299_vm7, %v297_v55, %v265_v21 }
 0x254   :  { %v307_v1 = vsel %vm304_vm8, %v302_v57, %v277_v23 }
 0x255   :  { %v231_v49 = vpop.permute.xlu1 %230  ;;  %v315_v11 = vmul.f32 %v311_v4, %v307_v1 }
 0x256   :  { %v288_v59 = vsel %vm284_vm4, %v1540_v10, %v231_v49  ;;  %v471_v10 = vpop.permute.xlu0 %470 }
 0x257   :  { %v502_v25 = vmul.f32 %v471_v10, %v1493_v63  ;;  %v317_v10 = vld [vmem:[#allocation5 + $0x168] sm:$0xff] }
 0x259   :  { %v243_v51 = vpop.permute.xlu1 %242 }
 0x25a   :  { %v293_v0 = vsel %vm289_vm5, %v288_v59, %v243_v51  ;;  %v475_v22 = vpop.permute.xlu0 %474 }
 0x25b   :  { %v504_v30 = vmul.f32 %v475_v22, %v1493_v63 }
 0x25d   :  { %v255_v54 = vpop.permute.xlu1 %254 }
 0x25e   :  { %v298_v3 = vsel %vm294_vm6, %v293_v0, %v255_v54  ;;  %v479_v28 = vpop.permute.xlu0 %478 }
 0x25f   :  { %v506_v34 = vmul.f32 %v479_v28, %v1493_v63 }
 0x261   :  { %v267_v58 = vpop.permute.xlu1 %266 }
 0x262   :  { %v303_v5 = vsel %vm299_vm7, %v298_v3, %v267_v58  ;;  %v483_v36 = vpop.permute.xlu0 %482 }
 0x263   :  { %v508_v39 = vmul.f32 %v483_v36, %v1493_v63 }
 0x265   :  { %v279_v6 = vpop.permute.xlu1 %278 }
 0x266   :  { %v308_v7 = vsel %vm304_vm8, %v303_v5, %v279_v6  ;;  %v639_v6 = vld [vmem:[#allocation5 + $0x20] sm:$0xff] }
 0x267   :  { %v316_v12 = vmul.f32 %v312_v2, %v308_v7  ;;  %v640_v7 = vld [vmem:[#allocation5 + $0x28] sm:$0xff] }
 0x269   :  { %v1195_v13 = vpack.c.bf16 %v316_v12, %v315_v11  ;;  %v324_v14 = vpop.permute.xlu1 %323  ;;  %v1225_v11 = vpack.c.bf16 %v640_v7, %v639_v6  ;;  %v642_v12 = vld [vmem:[#allocation5 + $0x38] sm:$0x3f] }
 0x26b   :  { %1197 = vmatprep.subr.msk.bf16.mxu0 %vm1463_vm3, %v1195_v13  ;;  %1226 = vmatprep.subr.bf16.mxu1 %v1225_v11 }
 0x26c   :  { %1200 = vmatpush3.bf16.msk.msra.mxu0 %vm1463_vm3, %v1195_v13  ;;  %v1229_v13 = vpack.c.bf16 %v642_v12, %v641_v9  ;;  %1228 = vmatpush3.bf16.msra.mxu1 %v1225_v11 }
 0x26d   :  { %v465_v15 = vpop.permute.xlu1 %464 }
 0x26e   :  { %v499_v17 = vmul.f32 %v1491_v62, %v465_v15  ;;  %1231 = vmatprep.subr.msk.bf16.mxu1 %vm1463_vm3, %v1229_v13 }
 0x26f   :  { %1097 = vmatmul.mubr.msk.f32.vlgmr.msra.gmra.mrb[2].mxu0 %vm43_vm1, %v324_v14  ;;  %v318_v14 = vld [vmem:[#allocation5 + $0x170] sm:$0xff] }
 0x270   :  { %v1288_v18 = vpack.i.bf16 %v499_v17, %v498_v16  ;;  %1234 = vmatpush3.bf16.msk.msra.mxu1 %vm1463_vm3, %v1229_v13 }
 0x271   :  { %v469_v19 = vpop.permute.xlu1 %468 }
 0x272   :  { %v501_v21 = vmul.f32 %v1491_v62, %v469_v19  ;;  %1289 = vrot.lane.b32.xlu0 %v1288_v18, %s1416_s12 }
 0x274   :  { %v1293_v23 = vpack.i.bf16 %v501_v21, %v500_v20 }
 0x275   :  { %v473_v24 = vpop.permute.xlu1 %472 }
 0x276   :  { %v503_v26 = vmul.f32 %v1491_v62, %v473_v24  ;;  %1294 = vrot.lane.b32.xlu1 %v1293_v23, %s1416_s12 }
 0x278   :  { %v1298_v27 = vpack.i.bf16 %v503_v26, %v502_v25 }
 0x279   :  { %v477_v29 = vpop.permute.xlu1 %476 }
 0x27a   :  { %v505_v31 = vmul.f32 %v1491_v62, %v477_v29  ;;  %1299 = vrot.lane.b32.xlu0 %v1298_v27, %s1416_s12 }
 0x27c   :  { %v1303_v32 = vpack.i.bf16 %v505_v31, %v504_v30 }
 0x27d   :  { %v481_v33 = vpop.permute.xlu1 %480 }
 0x27e   :  { %v507_v35 = vmul.f32 %v1491_v62, %v481_v33  ;;  %1304 = vrot.lane.b32.xlu1 %v1303_v32, %s1416_s12 }
 0x280   :  { %v1308_v37 = vpack.i.bf16 %v507_v35, %v506_v34 }
 0x281   :  { %v485_v38 = vpop.permute.xlu1 %484 }
 0x282   :  { %v509_v40 = vmul.f32 %v1491_v62, %v485_v38  ;;  %1309 = vrot.lane.b32.xlu0 %v1308_v37, %s1416_s12 }
 0x284   :  { %v1313_v41 = vpack.i.bf16 %v509_v40, %v508_v39 }
 0x286   :  { %1314 = vrot.lane.b32.xlu1 %v1313_v41, %s1416_s12 }
 0x2e4   :  { %v1290_v42 = vpop.permute.xlu0 %1289 }
 0x2e5   :  { %v1292_v43 = vunpack.i.h.bf16 %v1290_v42  ;;  %v1291_v45 = vunpack.i.l.bf16 %v1290_v42 }
 0x2e7   :  { %v1201_v46 = vpack.c.bf16 %v1292_v43, %v1291_v45 }
 0x2e8   :  { %v1295_v47 = vpop.permute.xlu1 %1294 }
 0x2e9   :  { %v1297_v48 = vunpack.i.h.bf16 %v1295_v47  ;;  %v1296_v49 = vunpack.i.l.bf16 %v1295_v47  ;;  %1202 = vmatprep.subr.bf16.mxu0 %v1201_v46 }
 0x2ea   :  { %1204 = vmatpush3.bf16.msra.mxu0 %v1201_v46 }
 0x2eb   :  { %v1205_v51 = vpack.c.bf16 %v1297_v48, %v1296_v49 }
 0x2ec   :  { %v1300_v52 = vpop.permute.xlu0 %1299 }
 0x2ed   :  { %v1302_v53 = vunpack.i.h.bf16 %v1300_v52  ;;  %v1301_v54 = vunpack.i.l.bf16 %v1300_v52  ;;  %1206 = vmatprep.subr.bf16.mxu0 %v1205_v51 }
 0x2ee   :  { %1208 = vmatpush3.bf16.msra.mxu0 %v1205_v51 }
 0x2ef   :  { %v1209_v63 = vpack.c.bf16 %v1302_v53, %v1301_v54  ;;  %v787_v53 = vld [vmem:[#allocation5 + $0x40] sm:$0xff]  ;;  %v788_v54 = vld [vmem:[#allocation5 + $0x48] sm:$0xff] }
 0x2f0   :  { %v1305_v62 = vpop.permute.xlu1 %1304 }
 0x2f1   :  { %v1307_v55 = vunpack.i.h.bf16 %v1305_v62  ;;  %v1306_v56 = vunpack.i.l.bf16 %v1305_v62  ;;  %1210 = vmatprep.subr.bf16.mxu0 %v1209_v63  ;;  %v789_v62 = vld [vmem:[#allocation5 + $0x50] sm:$0xff] }
 0x2f2   :  { %1212 = vmatpush3.bf16.msra.mxu0 %v1209_v63  ;;  %v1235_v63 = vpack.c.bf16 %v788_v54, %v787_v53 }
 0x2f3   :  { %v1213_v57 = vpack.c.bf16 %v1307_v55, %v1306_v56  ;;  %v790_v55 = vld [vmem:[#allocation5 + $0x58] sm:$0x3f] }
 0x2f4   :  { %v1310_v58 = vpop.permute.xlu0 %1309  ;;  %1236 = vmatprep.subr.bf16.mxu1 %v1235_v63  ;;  %v1239_v56 = vpack.c.bf16 %v790_v55, %v789_v62  ;;  %v884_v62 = vld [vmem:[#allocation5 + $0x70] sm:$0xff]  ;;  %v885_v55 = vld [vmem:[#allocation5 + $0x78] sm:$0xff] }
 0x2f5   :  { %v1312_v59 = vunpack.i.h.bf16 %v1310_v58  ;;  %v1311_v0 = vunpack.i.l.bf16 %v1310_v58  ;;  %1214 = vmatprep.subr.bf16.mxu0 %v1213_v57  ;;  %v883_v58 = vld [vmem:[#allocation5 + $0x68] sm:$0xff] }
 0x2f6   :  { %1216 = vmatpush3.bf16.msra.mxu0 %v1213_v57  ;;  %v882_v57 = vld [vmem:[#allocation5 + $0x60] sm:$0xff] }
 0x2f7   :  { %v1217_v1 = vpack.c.bf16 %v1312_v59, %v1311_v0  ;;  %v1617_v59 = vpack.c.bf16 %v883_v58, %v882_v57  ;;  %v645_v0 = vsub.s32 4, %v1475_v44  ;;  %v1249_v58 = vpack.c.bf16 %v885_v55, %v884_v62 }
 0x2f8   :  { %v1315_v3 = vpop.permute.xlu1 %1314 }
 0x2f9   :  { %v1317_v4 = vunpack.i.h.bf16 %v1315_v3  ;;  %v1316_v2 = vunpack.i.l.bf16 %v1315_v3  ;;  %1218 = vmatprep.subr.bf16.mxu0 %v1217_v1 }
 0x2fa   :  { %1220 = vmatpush3.bf16.msra.mxu0 %v1217_v1  ;;  %v646_v1 = vrot.slane %v1478_v50, %v645_v0  ;;  %v886_v0 = vld [vmem:[#allocation5 + $0x80] sm:$0xff] }
 0x2fb   :  { %v1221_v5 = vpack.c.bf16 %v1317_v4, %v1316_v2 }
 0x2fd   :  { %1222 = vmatprep.subr.bf16.mxu0 %v1221_v5 }
 0x2fe   :  { %1224 = vmatpush3.bf16.msra.mxu0 %v1221_v5 }
 0x342   :  { %v1098_v15 = vpop.f32.mrb[2].mxu0 }
 0x343   :  { %v404_v16 = vadd.f32 %v1098_v15, %v318_v14  ;;  %v398_v17 = vpop.f32.mrb[3].mxu0 }
 0x344   :  { %v399_v18 = vadd.f32 %v398_v17, %v317_v10 }
 0x345   :  { %v409_v19 = vsel %vm407_vm9, %v404_v16, -inf }
 0x346   :  { %v408_v20 = vsel %vm407_vm9, %v399_v18, -inf }
 0x347   :  { %v410_v21 = vmax.f32 %v408_v20, %v409_v19 }
 0x349   :  { %v411_v22 = vrot.slane %v410_v21, 4 }
 0x34b   :  { %v412_v23 = vmax.f32 %v410_v21, %v411_v22 }
 0x34d   :  { %v413_v24 = vrot.slane %v412_v23, 2 }
 0x34f   :  { %v414_v25 = vmax.f32 %v412_v23, %v413_v24 }
 0x351   :  { %v415_v26 = vrot.slane %v414_v25, 1 }
 0x353   :  { %v416_v27 = vmax.f32 %v414_v25, %v415_v26 }
 0x355   :  { %v417_v28 = vsub.f32 %v399_v18, %v416_v27  ;;  %v418_v29 = vsub.f32 %v404_v16, %v416_v27 }
 0x357   :  { %v419_v30 = vmul.f32 1.442695, %v417_v28  ;;  %v421_v31 = vmul.f32 1.442695, %v418_v29 }
 0x359   :  { %1322 = vpow2.f32 %v419_v30 }
 0x35a   :  { %1324 = vpow2.f32 %v421_v31 }
 0x363   :  { %v1323_v32 = vpop.eup %1322 }
 0x364   :  { %v1325_v33 = vpop.eup %1324  ;;  %v423_v34 = vsel %vm407_vm9, %v1323_v32, 0.0 }
 0x365   :  { %v424_v35 = vsel %vm407_vm9, %v1325_v33, 0.0 }
 0x366   :  { %v425_v36 = vadd.f32 %v424_v35, %v423_v34 }
 0x368   :  { %v426_v37 = vrot.slane %v425_v36, 4 }
 0x36a   :  { %v427_v38 = vadd.f32 %v426_v37, %v425_v36 }
 0x36c   :  { %v428_v39 = vrot.slane %v427_v38, 2 }
 0x36e   :  { %v429_v40 = vadd.f32 %v428_v39, %v427_v38 }
 0x370   :  { %v430_v41 = vrot.slane %v429_v40, 1 }
 0x372   :  { %v431_v42 = vadd.f32 %v430_v41, %v429_v40 }
 0x374   :  { %1326 = vrcp.f32 %v431_v42 }
 0x37e   :  { %v1327_v43 = vpop.eup %1326 }
 0x37f   :  { %v433_v45 = vmul.f32 %v1327_v43, %v431_v42 }
 0x381   :  { %v434_v46 = vsub.f32 2.0, %v433_v45  ;;  %v771_v45 = vsub.s32 2, %v1475_v44 }
 0x383   :  { %v435_v47 = vmul.f32 %v1327_v43, %v434_v46  ;;  %v772_v46 = vrot.slane %v1478_v50, %v771_v45 }
 0x385   :  { %v436_v48 = vmul.f32 %v1323_v32, %v435_v47  ;;  %v437_v49 = vmul.f32 %v1325_v33, %v435_v47  ;;  %v783_v47 = vsub.s32 3, %v1475_v44 }
 0x387   :  { %1123 = vmatprep.mubr.msk.f32.mxu0 %vm407_vm9, %v436_v48 }
 0x388   :  { %1124 = vmatmul.mubr.msk.f32.vlgmr.msra.gmra.mrb[4].mxu0 %vm407_vm9, %v437_v49 }
 0x45b   :  { %v1125_v51 = vpop.f32.mrb[4].mxu0 }
 0x45c   :  { %v630_v52 = vpop.f32.mrb[5].mxu0 }
 0x45d   :  { %1134 = vmatprep.mubr.msk.f32.mxu1 %vm43_vm1, %v630_v52  ;;  %v784_v52 = vrot.slane %v1478_v50, %v783_v47 }
 0x45e   :  { %1135 = vmatmul.mubr.msk.f32.vlgmr.msra.gmra.mrb[0].mxu1 %vm43_vm1, %v1125_v51 }
 0x45f   :  { %1238 = vmatpush3.bf16.msra.mxu1 %v1235_v63 }
 0x460   :  { %1241 = vmatprep.subr.msk.bf16.mxu1 %vm1463_vm3, %v1239_v56 }
 0x463   :  { %1244 = vmatpush3.bf16.msk.msra.mxu1 %vm1463_vm3, %v1239_v56 }
 0x464   :  { %1246 = vmatprep.subr.bf16.mxu1 %v1617_v59 }
 0x531   :  { %v1136_v3 = vpop.f32.mrb[0].mxu1 }
 0x532   :  { %v728_v4 = vadd.f32 %v1136_v3, %v646_v1  ;;  %v722_v2 = vpop.f32.mrb[1].mxu1 }
 0x533   :  { %v723_v5 = vadd.f32 %v722_v2, %v646_v1  ;;  %v887_v1 = vld [vmem:[#allocation5 + $0x88] sm:$0xff]  ;;  %v889_v2 = vld [vmem:[#allocation5 + $0x98] sm:$0xff] }
 0x534   :  { %v732_v6 = vadd.f32 %v728_v4, %v1485_v61  ;;  %v1253_v3 = vpack.c.bf16 %v887_v1, %v886_v0  ;;  %v888_v4 = vld [vmem:[#allocation5 + $0x90] sm:$0xff] }
 0x535   :  { %v731_v7 = vadd.f32 %v723_v5, %v1483_v60  ;;  %v1257_v5 = vpack.c.bf16 %v889_v2, %v888_v4 }
 0x536   :  { %v740_v8 = vsel %vm43_vm1, %v732_v6, 0.0 }
 0x537   :  { %v741_v9 = vrot.slane %v740_v8, 4  ;;  %v733_v11 = vsel %vm43_vm1, %v731_v7, 0.0 }
 0x538   :  { %v734_v12 = vrot.slane %v733_v11, 4 }
 0x539   :  { %v742_v13 = vadd.f32 %v741_v9, %v740_v8  ;;  %v892_v9 = vld [vmem:[#allocation5 + $0xb0] sm:$0xff] }
 0x53a   :  { %v735_v14 = vadd.f32 %v734_v12, %v733_v11  ;;  %v893_v11 = vld [vmem:[#allocation5 + $0xb8] sm:$0xff] }
 0x53b   :  { %v743_v10 = vrot.slane %v742_v13, 2  ;;  %v1265_v12 = vpack.c.bf16 %v893_v11, %v892_v9 }
 0x53c   :  { %v736_v15 = vrot.slane %v735_v14, 2 }
 0x53d   :  { %v744_v16 = vadd.f32 %v743_v10, %v742_v13  ;;  %v895_v13 = vld [vmem:[#allocation5 + $0xc8] sm:$0xff]  ;;  %v896_v10 = vld [vmem:[#allocation5 + $0xd0] sm:$0xff] }
 0x53e   :  { %v737_v17 = vadd.f32 %v736_v15, %v735_v14  ;;  %v1016_v15 = vld [vmem:[#allocation5 + $0xe0] ss:$0 sm:$0xff] }
 0x53f   :  { %v745_v18 = vrot.slane %v744_v16, 1 }
 0x540   :  { %v738_v19 = vrot.slane %v737_v17, 1 }
 0x541   :  { %v746_v20 = vadd.f32 %v745_v18, %v744_v16 }
 0x542   :  { %v739_v21 = vadd.f32 %v738_v19, %v737_v17 }
 0x543   :  { %v748_v22 = vmul.f32 0.125, %v746_v20 }
 0x544   :  { %v747_v61 = vmul.f32 0.125, %v739_v21 }
 0x545   :  { %v750_v23 = vsub.f32 %v732_v6, %v748_v22  ;;  %v890_v6 = vld [vmem:[#allocation5 + $0xa0] sm:$0xff]  ;;  %v899_v22 = vsub.s32 5, %v1475_v44 }
 0x546   :  { %v749_v60 = vsub.f32 %v731_v7, %v747_v61  ;;  %v891_v7 = vld [vmem:[#allocation5 + $0xa8] sm:$0xff] }
 0x547   :  { %v752_v24 = vmul.f32 %v750_v23, %v750_v23  ;;  %v774_v48 = vmul.f32 %v772_v46, %v750_v23  ;;  %v1261_v8 = vpack.c.bf16 %v891_v7, %v890_v6  ;;  %v900_v61 = vrot.slane %v1478_v50, %v899_v22 }
 0x548   :  { %v751_v25 = vmul.f32 %v749_v60, %v749_v60  ;;  %v773_v51 = vmul.f32 %v772_v46, %v749_v60 }
 0x549   :  { %v760_v26 = vsel %vm43_vm1, %v752_v24, 0.0 }
 0x54a   :  { %v761_v27 = vrot.slane %v760_v26, 4  ;;  %v753_v28 = vsel %vm43_vm1, %v751_v25, 0.0 }
 0x54b   :  { %v754_v29 = vrot.slane %v753_v28, 4 }
 0x54c   :  { %v762_v30 = vadd.f32 %v761_v27, %v760_v26 }
 0x54d   :  { %v755_v31 = vadd.f32 %v754_v29, %v753_v28 }
 0x54e   :  { %v763_v32 = vrot.slane %v762_v30, 2 }
 0x54f   :  { %v756_v33 = vrot.slane %v755_v31, 2 }
 0x550   :  { %v764_v34 = vadd.f32 %v763_v32, %v762_v30 }
 0x551   :  { %v757_v35 = vadd.f32 %v756_v33, %v755_v31 }
 0x552   :  { %v765_v36 = vrot.slane %v764_v34, 1 }
 0x553   :  { %v758_v37 = vrot.slane %v757_v35, 1 }
 0x554   :  { %v766_v38 = vadd.f32 %v765_v36, %v764_v34 }
 0x555   :  { %v759_v39 = vadd.f32 %v758_v37, %v757_v35 }
 0x556   :  { %v768_v40 = vmul.f32 0.14285715, %v766_v38 }
 0x557   :  { %v767_v41 = vmul.f32 0.14285715, %v759_v39 }
 0x558   :  { %v776_v42 = vadd.f32 1e-05, %v768_v40 }
 0x559   :  { %v775_v43 = vadd.f32 1e-05, %v767_v41 }
 0x55a   :  { %1328 = vrsqrt.f32 %v776_v42 }
 0x55b   :  { %1330 = vrsqrt.f32 %v775_v43 }
 0x564   :  { %v1329_v49 = vpop.eup %1328 }
 0x565   :  { %v1331_v53 = vpop.eup %1330  ;;  %v780_v54 = vmul.f32 %v1329_v49, %v774_v48 }
 0x566   :  { %v779_v63 = vmul.f32 %v1331_v53, %v773_v51 }
 0x567   :  { %v786_v57 = vadd.f32 %v784_v52, %v780_v54 }
 0x568   :  { %v785_v56 = vadd.f32 %v784_v52, %v779_v63 }
 0x56a   :  { %1145 = vmatprep.mubr.msk.f32.mxu1 %vm43_vm1, %v785_v56 }
 0x56b   :  { %1146 = vmatmul.mubr.msk.f32.vlgmr.msra.gmra.mrb[2].mxu1 %vm43_vm1, %v786_v57 }
 0x56c   :  { %1248 = vmatpush3.bf16.msra.mxu1 %v1617_v59  ;;  %v894_v59 = vld [vmem:[#allocation5 + $0xc0] sm:$0xff] }
 0x56d   :  { %1250 = vmatprep.subr.bf16.mxu1 %v1249_v58  ;;  %v1269_v14 = vpack.c.bf16 %v895_v13, %v894_v59 }
 0x570   :  { %1252 = vmatpush3.bf16.msra.mxu1 %v1249_v58 }
 0x571   :  { %1254 = vmatprep.subr.bf16.mxu1 %v1253_v3 }
 0x574   :  { %1256 = vmatpush3.bf16.msra.mxu1 %v1253_v3 }
 0x575   :  { %1258 = vmatprep.subr.bf16.mxu1 %v1257_v5 }
 0x578   :  { %1260 = vmatpush3.bf16.msra.mxu1 %v1257_v5 }
 0x579   :  { %1262 = vmatprep.subr.bf16.mxu1 %v1261_v8 }
 0x57c   :  { %1264 = vmatpush3.bf16.msra.mxu1 %v1261_v8 }
 0x57d   :  { %1266 = vmatprep.subr.bf16.mxu1 %v1265_v12 }
 0x580   :  { %1268 = vmatpush3.bf16.msra.mxu1 %v1265_v12 }
 0x581   :  { %1270 = vmatprep.subr.bf16.mxu1 %v1269_v14 }
 0x584   :  { %1272 = vmatpush3.bf16.msra.mxu1 %v1269_v14 }
 0x585   :  { %1176 = vmatprep.subr.mxu1 %v896_v10 }
 0x588   :  { %1177 = vmatpush3.msra.mxu1 %v896_v10 }
 0x63e   :  { %v1147_v16 = vpop.f32.mrb[2].mxu1 }
 0x63f   :  { %v877_v17 = vadd.f32 %v1147_v16, %v1016_v15  ;;  %v871_v18 = vpop.f32.mrb[3].mxu1 }
 0x640   :  { %v872_v19 = vadd.f32 %v1016_v15, %v871_v18 }
 0x641   :  { %v881_v21 = vmax.f32 %v877_v17, 0.0 }
 0x642   :  { %v880_v20 = vmax.f32 %v872_v19, 0.0 }
 0x644   :  { %1178 = vmatprep.mubr.msk.f32.mxu1 %vm901_vm10, %v880_v20 }
 0x645   :  { %1179 = vmatmul.mubr.msk.f32.vlgmr.msra.gmra.mrb[4].mxu1 %vm901_vm10, %v881_v21 }
 0x718   :  { %v1180_v23 = vpop.f32.mrb[4].mxu1 }
 0x719   :  { %v980_v60 = vadd.f32 %v1180_v23, %v900_v61  ;;  %v974_v24 = vpop.f32.mrb[5].mxu1 }
 0x71a   :  { %v975_v25 = vadd.f32 %v974_v24, %v900_v61 }
 0x71b   :  { %v984_v26 = vadd.f32 %v980_v60, %v786_v57 }
 0x71c   :  { %v983_v27 = vadd.f32 %v975_v25, %v785_v56 }
 0x71d   :  { %986 = vst.msk [vmem:[#allocation7 + $0x8] sm:$0xff] %vm43_vm1, %v984_v26 }
 0x71e   :  { %985 = vst.msk [vmem:[#allocation7] sm:$0xff] %vm43_vm1, %v983_v27 }
 0x71f   :  { %1387 = shalt.err (!%p1384_p6)
}
 0x720   :  { %s1388_s18 = scalar_lea.hbm %s1656_s2, 256 }
 0x721   :  { %p1389_p7 = scmp.ne.s32.totalorder %s1656_s2, %s1388_s18  ;;  %p1392_p8 = scmp.lt.u32.totalorder %s1388_s18, %s1656_s2 }
 0x723   :  { %p1394_p9 = pnand %p1392_p8, %p1389_p7 }
 0x725   :  { %1397 = shalt.err (!%p1394_p9)
}
 0x726   :  { %998 = dma.vmem_to_hbm [thread:$0]  %s993_s14, 256, %s1656_s2, [#allocation4], %s1405_s19, %s1405_s19, %s1406_s20  }
 0x727   :  { %1402 = dma.done.wait [#allocation4], 256  }
 0x728   :  { %1403 = vsyncadd [#allocation4], 4294967040 }
 0x729   :  { %1002 = vsyncpa [#allocation3], 1 }
 0x72a   :  { %1003 = vsyncpa [#allocation6], 1 }
 0x72b   :  { %1004 = vsyncpa [#allocation4], 1 }

</bundles_post_ra>
